<compile_context>
chip_gen: v5e
topology: v5e:2x2
jax: 0.10.0
libtpu: 0.0.40
codegen_flags: <defaults>
</compile_context>

<pallas_src>
import functools

import jax
import jax.numpy as jnp
from jax import lax
from jax.experimental import pallas as pl
from jax.experimental.pallas import tpu as pltpu


def _fuse_kernel(defea_ref, x_ref, w1_ref, w2_ref, b_ref, o_ref):
    # Global average pool over the (lane-dense) spatial axis, accumulated in f32.
    x = x_ref[...].astype(jnp.float32)               # (TB, C, HW)
    inv_hw = 1.0 / x_ref.shape[-1]                   # static
    pooled = jnp.sum(x, axis=-1) * inv_hw            # (TB, C) f32

    # Split linear, transposed-B contraction (weights stay in PyTorch layout):
    #   out = defea @ w1^T + pooled @ w2^T + b
    dn = (((1,), (1,)), ((), ()))
    out = lax.dot_general(
        defea_ref[...].astype(jnp.float32), w1_ref[...], dn,
        preferred_element_type=jnp.float32,
    )
    out = out + lax.dot_general(
        pooled, w2_ref[...], dn, preferred_element_type=jnp.float32,
    )
    out = out + b_ref[...].astype(jnp.float32)       # (1, OUT_P) broadcasts over TB
    o_ref[...] = out.astype(o_ref.dtype)


@functools.partial(jax.jit, static_argnames=("vmem_block_budget_bytes",))
def cross_layer_fuse(defea, x, weight, bias, *, vmem_block_budget_bytes=4 * 1024 * 1024):
    """defea: (B, D1), x: (B, D2, H, W), weight: (out, D1+D2) [PyTorch layout], bias: (out,)."""
    B, D1 = defea.shape
    _, D2, H, W = x.shape
    out_dims = weight.shape[0]
    HW = H * W

    # Lane-dense spatial layout: last dim = H*W (full 128-lane vregs, dense DMA).
    x2 = x.reshape(B, D2, HW)

    # Split the PyTorch-layout weight without transposing it (cheap slices only).
    w1 = weight[:, :D1]                              # (out, D1)
    w2 = weight[:, D1:]                              # (out, D2)

    # Lane-dense output: pad out_dims up to a multiple of 128 (zero rows / zero bias).
    out_p = ((out_dims + 127) // 128) * 128
    pad_o = out_p - out_dims
    if pad_o:
        w1 = jnp.pad(w1, ((0, pad_o), (0, 0)))
        w2 = jnp.pad(w2, ((0, pad_o), (0, 0)))
        b = jnp.pad(bias, (0, pad_o)).reshape(1, out_p)
    else:
        b = bias.reshape(1, out_p)

    # Batch tile: largest that keeps the double-buffered x block under budget.
    bytes_per_row = D2 * HW * 4                      # f32 bytes per batch row of x
    tb_budget = max(1, vmem_block_budget_bytes // (2 * bytes_per_row))
    if tb_budget >= B:
        tb = B                                       # single full-extent block
        bp = B
    else:
        tb = max(8, (tb_budget // 8) * 8)            # multiple of 8 (sublane-aligned)
        bp = pl.cdiv(B, tb) * tb                     # pad batch to a tile multiple

    if bp != B:
        defea_p = jnp.pad(defea, ((0, bp - B), (0, 0)))
        x2 = jnp.pad(x2, ((0, bp - B), (0, 0), (0, 0)))
    else:
        defea_p = defea

    grid = (bp // tb,)

    out = pl.pallas_call(
        _fuse_kernel,
        out_shape=jax.ShapeDtypeStruct((bp, out_p), defea.dtype),
        grid=grid,
        in_specs=[
            pl.BlockSpec((tb, D1), lambda i: (i, 0)),        # defea: tiled over batch
            pl.BlockSpec((tb, D2, HW), lambda i: (i, 0, 0)),  # x: tiled over batch, lane-dense
            pl.BlockSpec((out_p, D1), lambda i: (0, 0)),      # w1: resident across grid
            pl.BlockSpec((out_p, D2), lambda i: (0, 0)),      # w2: resident across grid
            pl.BlockSpec((1, out_p), lambda i: (0, 0)),       # bias: resident across grid
        ],
        out_specs=pl.BlockSpec((tb, out_p), lambda i: (i, 0)),
        compiler_params=pltpu.CompilerParams(
            dimension_semantics=("parallel",),       # megacore sharding on v7x
        ),
    )(defea_p, x2, w1, w2, b)

    return out[:B, :out_dims]


if __name__ == "__main__":
    # Small, module-consistent shapes.
    B, in_dims1, in_dims2, H, W, out_dims = 2, 4, 4, 16, 16, 8

    key = jax.random.PRNGKey(0)
    k_defea, k_x, k_w, k_b = jax.random.split(key, 4)

    defea = jax.random.normal(k_defea, (B, in_dims1), dtype=jnp.float32)
    x = jax.random.normal(k_x, (B, in_dims2, H, W), dtype=jnp.float32)

    # Deterministic parameter init (synthetic; PyTorch Linear shapes).
    fan_in = in_dims1 + in_dims2
    bound = 1.0 / (fan_in ** 0.5)
    weight = jax.random.uniform(
        k_w, (out_dims, fan_in), minval=-bound, maxval=bound, dtype=jnp.float32
    )
    bias = jax.random.uniform(
        k_b, (out_dims,), minval=-bound, maxval=bound, dtype=jnp.float32
    )

    out = cross_layer_fuse(defea, x, weight, bias)
    jax.block_until_ready(out)

    # Pure-JAX reference check of the forward semantics.
    pooled_ref = jnp.mean(x, axis=(2, 3))
    ref = jnp.concatenate([defea, pooled_ref], axis=1) @ weight.T + bias
    assert out.shape == (B, out_dims)
    assert jnp.allclose(out, ref, atol=1e-5, rtol=1e-5)

    print("KERNEL_OK")
</pallas_src>

<mosaic_0001>
module attributes {stable_mosaic.version = 11 : i64} {
  func.func @_fuse_kernel(%arg0: i32, %arg1: memref<2x4xf32, #tpu.memory_space<vmem>>, %arg2: memref<2x4x256xf32, #tpu.memory_space<vmem>>, %arg3: memref<128x4xf32, #tpu.memory_space<vmem>>, %arg4: memref<128x4xf32, #tpu.memory_space<vmem>>, %arg5: memref<1x128xf32, #tpu.memory_space<vmem>>, %arg6: memref<2x128xf32, #tpu.memory_space<vmem>>) attributes {dimension_semantics = [#tpu.dimension_semantics<parallel>], iteration_bounds = array<i64: 1>, scalar_prefetch = 0 : i64, scratch_operands = 0 : i64, tpu.core_type = #tpu.core_type<tc>, window_params = [{transform_indices = @transform_0, window_bounds = array<i64: 2, 4>}, {transform_indices = @transform_1, window_bounds = array<i64: 2, 4, 256>}, {pipeline_mode = #tpu.pipeline_mode<synchronous>, transform_indices = @transform_2, window_bounds = array<i64: 128, 4>}, {pipeline_mode = #tpu.pipeline_mode<synchronous>, transform_indices = @transform_3, window_bounds = array<i64: 128, 4>}, {pipeline_mode = #tpu.pipeline_mode<synchronous>, transform_indices = @transform_4, window_bounds = array<i64: 1, 128>}, {transform_indices = @transform_5, window_bounds = array<i64: 2, 128>}]} {
    %c0 = arith.constant 0 : index
    %c0_0 = arith.constant 0 : index
    %c0_1 = arith.constant 0 : index
    %0 = vector.load %arg2[%c0, %c0_0, %c0_1] : memref<2x4x256xf32, #tpu.memory_space<vmem>>, vector<2x4x256xf32>
    %cst = arith.constant dense<0.000000e+00> : vector<2x4xf32>
    %1 = vector.multi_reduction <add>, %0, %cst [2] : vector<2x4x256xf32> to vector<2x4xf32>
    %cst_2 = arith.constant 3.906250e-03 : f32
    %2 = vector.broadcast %cst_2 : f32 to vector<2x4xf32>
    %3 = arith.mulf %1, %2 : vector<2x4xf32>
    %c0_3 = arith.constant 0 : index
    %c0_4 = arith.constant 0 : index
    %4 = vector.load %arg1[%c0_3, %c0_4] : memref<2x4xf32, #tpu.memory_space<vmem>>, vector<2x4xf32>
    %c0_5 = arith.constant 0 : index
    %c0_6 = arith.constant 0 : index
    %5 = vector.load %arg3[%c0_5, %c0_6] : memref<128x4xf32, #tpu.memory_space<vmem>>, vector<128x4xf32>
    %cst_7 = arith.constant dense<0.000000e+00> : vector<2x128xf32>
    %6 = tpu.matmul %4, %5, %cst_7 {dimension_numbers = #tpu.dot_dimension_numbers<[1], [1], [0], [0], [0, 0, 1, 0], [], []>} : vector<2x4xf32>, vector<128x4xf32>, vector<2x128xf32> -> vector<2x128xf32>
    %c0_8 = arith.constant 0 : index
    %c0_9 = arith.constant 0 : index
    %7 = vector.load %arg4[%c0_8, %c0_9] : memref<128x4xf32, #tpu.memory_space<vmem>>, vector<128x4xf32>
    %cst_10 = arith.constant dense<0.000000e+00> : vector<2x128xf32>
    %8 = tpu.matmul %3, %7, %cst_10 {dimension_numbers = #tpu.dot_dimension_numbers<[1], [1], [0], [0], [0, 0, 1, 0], [], []>} : vector<2x4xf32>, vector<128x4xf32>, vector<2x128xf32> -> vector<2x128xf32>
    %9 = arith.addf %6, %8 : vector<2x128xf32>
    %c0_11 = arith.constant 0 : index
    %c0_12 = arith.constant 0 : index
    %10 = vector.load %arg5[%c0_11, %c0_12] : memref<1x128xf32, #tpu.memory_space<vmem>>, vector<1x128xf32>
    %11 = vector.broadcast %10 : vector<1x128xf32> to vector<2x128xf32>
    %12 = arith.addf %9, %11 : vector<2x128xf32>
    %c0_13 = arith.constant 0 : index
    %c0_14 = arith.constant 0 : index
    %13 = vector.load %arg6[%c0_13, %c0_14] : memref<2x128xf32, #tpu.memory_space<vmem>>, vector<2x128xf32>
    tpu.vector_store %arg6[%c0_13, %c0_14], %12 {strides = array<i32>} : memref<2x128xf32, #tpu.memory_space<vmem>>, vector<2x128xf32>,
    return
  }
  func.func @transform_0(%arg0: i32) -> (i32, i32) {
    %c0_i32 = arith.constant 0 : i32
    %c0_i32_0 = arith.constant 0 : i32
    return %arg0, %c0_i32 : i32, i32
  }
  func.func @transform_1(%arg0: i32) -> (i32, i32, i32) {
    %c0_i32 = arith.constant 0 : i32
    %c0_i32_0 = arith.constant 0 : i32
    %c0_i32_1 = arith.constant 0 : i32
    return %arg0, %c0_i32, %c0_i32_0 : i32, i32, i32
  }
  func.func @transform_2(%arg0: i32) -> (i32, i32) {
    %c0_i32 = arith.constant 0 : i32
    %c0_i32_0 = arith.constant 0 : i32
    %c0_i32_1 = arith.constant 0 : i32
    return %c0_i32, %c0_i32_0 : i32, i32
  }
  func.func @transform_3(%arg0: i32) -> (i32, i32) {
    %c0_i32 = arith.constant 0 : i32
    %c0_i32_0 = arith.constant 0 : i32
    %c0_i32_1 = arith.constant 0 : i32
    return %c0_i32, %c0_i32_0 : i32, i32
  }
  func.func @transform_4(%arg0: i32) -> (i32, i32) {
    %c0_i32 = arith.constant 0 : i32
    %c0_i32_0 = arith.constant 0 : i32
    %c0_i32_1 = arith.constant 0 : i32
    return %c0_i32, %c0_i32_0 : i32, i32
  }
  func.func @transform_5(%arg0: i32) -> (i32, i32) {
    %c0_i32 = arith.constant 0 : i32
    %c0_i32_0 = arith.constant 0 : i32
    return %arg0, %c0_i32 : i32, i32
  }
}

</mosaic_0001>

<bundles_post_ra>
// kernel: cross_layer_fuse.1
= control target key start
LH: loop header
LB: loop body
LE: loop exit
PB: predicated region body
PF: predicated region fallthrough
CT: control target
= control target key end

     0   :  { %vm90_vm0 = vcmask 31744   ;;  %vm36_vm1 = vcmask 1043456   ;;  %s496_s0 = inlined_call_operand.vmem [shape: f32[2,4], index: 0, kind: input, shape index: {}]   ;;  %s497_s1 = inlined_call_operand.vmem [shape: f32[2,4,256], index: 1, kind: input, shape index: {}]   ;;  %s498_s2 = inlined_call_operand.vmem [shape: f32[128,4], index: 2, kind: input, shape index: {}]   ;;  %s499_s3 = inlined_call_operand.vmem [shape: f32[128,4], index: 3, kind: input, shape index: {}]   ;;  %s500_s4 = inlined_call_operand.vmem [shape: f32[1,128], index: 4, kind: input, shape index: {}]   ;;  %s501_s5 = inlined_call_operand.hbm [shape: f32[2,128], index: 5, kind: output, shape index: {}]  }
   0x1   :  { %v21_v0 = vld [vmem:[%s497_s1] sm:$0xff]  ;;  %v22_v1 = vld [vmem:[%s497_s1 + $0x8] sm:$0xff]  ;;  %v81_v2 = vld [vmem:[%s499_s3 + $0x78] sm:$0xff] }
   0x2   :  { %25 = vst [vmem:[#allocation1] ss:$2 sm:$0xff] %v21_v0  ;;  %254 = vmatpush.xpose.msk.msra.mxu0 %vm90_vm0, %v81_v2  ;;  %v65_v3 = vld [vmem:[%s498_s2 + $0x78] sm:$0xff]  ;;  %v80_v4 = vld [vmem:[%s499_s3 + $0x70] sm:$0xff]  ;;  %v79_v6 = vld [vmem:[%s499_s3 + $0x68] sm:$0xff] }
   0x3   :  { %29 = vst [vmem:[#allocation1 + $0x10] ss:$2 sm:$0xff] %v22_v1  ;;  %271 = vmatpush.xpose.msk.msra.mxu1 %vm90_vm0, %v65_v3  ;;  %v64_v5 = vld [vmem:[%s498_s2 + $0x70] sm:$0xff]  ;;  %v63_v7 = vld [vmem:[%s498_s2 + $0x68] sm:$0xff]  ;;  %v78_v12 = vld [vmem:[%s499_s3 + $0x60] sm:$0xff] }
   0x4   :  { %v62_v16 = vld [vmem:[%s498_s2 + $0x60] sm:$0xff] }
   0x6   :  { %255 = vmatpush.xpose.msk.msra.mxu0 %vm90_vm0, %v80_v4 }
   0x7   :  { %272 = vmatpush.xpose.msk.msra.mxu1 %vm90_vm0, %v64_v5 }
   0x9   :  { %v26_v8 = vld.sshfl [vmem:[#allocation1] sm:$0xff pattern:$0x75316420]  ;;  %v27_v9 = vld.sshfl [vmem:[#allocation1 + $0x8] sm:$0xff pattern:$0x75316420] }
   0xa   :  { %v37_v10 = vsel %vm36_vm1, %v26_v8, 0.0  ;;  %v38_v11 = vsel %vm36_vm1, %v27_v9, 0.0  ;;  %256 = vmatpush.xpose.msk.msra.mxu0 %vm90_vm0, %v79_v6  ;;  %v30_v14 = vld.sshfl [vmem:[#allocation1 + $0x10] sm:$0xff pattern:$0x75316420] }
   0xb   :  { %v39_v13 = vadd.f32 %v38_v11, %v37_v10  ;;  %v31_v15 = vld.sshfl [vmem:[#allocation1 + $0x18] sm:$0xff pattern:$0x75316420]  ;;  %273 = vmatpush.xpose.msk.msra.mxu1 %vm90_vm0, %v63_v7 }
   0xc   :  { %10 = vsyncpa [#allocation3], 0  ;;  %v42_v17 = vsel %vm36_vm1, %v30_v14, 0.0  ;;  %v43_v18 = vsel %vm36_vm1, %v31_v15, 0.0  ;;  %v77_v19 = vld [vmem:[%s499_s3 + $0x58] sm:$0xff]  ;;  %v76_v22 = vld [vmem:[%s499_s3 + $0x50] sm:$0xff]  ;;  %v84_v46 = vlaneseq }
   0xd   :  { %40 = vadd.xlane.f32.xlu0 %v39_v13  ;;  %v61_v20 = vld [vmem:[%s498_s2 + $0x58] sm:$0xff]  ;;  %v44_v21 = vadd.f32 %v43_v18, %v42_v17  ;;  %v60_v23 = vld [vmem:[%s498_s2 + $0x50] sm:$0xff]  ;;  %v75_v24 = vld [vmem:[%s499_s3 + $0x48] sm:$0xff]  ;;  %vm88_vm2 = vcmask 1041409   ;;  %s245_s13 = sshll.u32 %s501_s5, 4  ;;  %s246_s13 = int_to_ptr.hbm [resolvable:$true] %s245_s13 }
   0xe   :  { %257 = vmatpush.xpose.msk.msra.mxu0 %vm90_vm0, %v78_v12  ;;  %v59_v25 = vld [vmem:[%s498_s2 + $0x48] sm:$0xff]  ;;  %v74_v26 = vld [vmem:[%s499_s3 + $0x40] sm:$0xff]  ;;  %v73_v28 = vld [vmem:[%s499_s3 + $0x38] sm:$0xff]  ;;  %v85_v47 = vand.u32 127, %v84_v46 }
   0xf   :  { %274 = vmatpush.xpose.msk.msra.mxu1 %vm90_vm0, %v62_v16  ;;  %v58_v27 = vld [vmem:[%s498_s2 + $0x40] sm:$0xff]  ;;  %v57_v29 = vld [vmem:[%s498_s2 + $0x38] sm:$0xff]  ;;  %v72_v30 = vld [vmem:[%s499_s3 + $0x30] sm:$0xff] }
  0x10   :  { %v56_v31 = vld [vmem:[%s498_s2 + $0x30] sm:$0xff]  ;;  %v71_v32 = vld [vmem:[%s499_s3 + $0x28] sm:$0xff]  ;;  %v70_v34 = vld [vmem:[%s499_s3 + $0x20] sm:$0xff] }
  0x11   :  { %v55_v33 = vld [vmem:[%s498_s2 + $0x28] sm:$0xff]  ;;  %v54_v35 = vld [vmem:[%s498_s2 + $0x20] sm:$0xff]  ;;  %v69_v36 = vld [vmem:[%s499_s3 + $0x18] sm:$0xff] }
  0x12   :  { %258 = vmatpush.xpose.msk.msra.mxu0 %vm90_vm0, %v77_v19  ;;  %v53_v37 = vld [vmem:[%s498_s2 + $0x18] sm:$0xff]  ;;  %v68_v38 = vld [vmem:[%s499_s3 + $0x10] sm:$0xff]  ;;  %v67_v40 = vld [vmem:[%s499_s3 + $0x8] sm:$0xff] }
  0x13   :  { %275 = vmatpush.xpose.msk.msra.mxu1 %vm90_vm0, %v61_v20  ;;  %v52_v39 = vld [vmem:[%s498_s2 + $0x10] sm:$0xff]  ;;  %v51_v41 = vld [vmem:[%s498_s2 + $0x8] sm:$0xff]  ;;  %v66_v42 = vld [vmem:[%s499_s3] sm:$0xff] }
  0x14   :  { %v50_v43 = vld [vmem:[%s498_s2] sm:$0xff] }
  0x15   :  { %45 = vadd.xlane.f32.xlu0 %v44_v21  ;;  %v49_v44 = vld [vmem:[%s496_s0] sm:$0x3]  ;;  %s316_s0 = smov [#allocation2]  }
  0x16   :  { %259 = vmatpush.xpose.msk.msra.mxu0 %vm90_vm0, %v76_v22  ;;  %v289_v55 = vld [vmem:[%s500_s4] ss:$0 sm:$0xff]  ;;  %s243_s10 = sshll.u32 %s316_s0, 4  ;;  %s244_s10 = int_to_ptr.vmem [resolvable:$true] %s243_s10 }
  0x17   :  { %276 = vmatpush.xpose.msk.msra.mxu1 %vm90_vm0, %v60_v23 }
  0x1a   :  { %260 = vmatpush.xpose.msk.msra.mxu0 %vm90_vm0, %v75_v24 }
  0x1b   :  { %277 = vmatpush.xpose.msk.msra.mxu1 %vm90_vm0, %v59_v25 }
  0x1e   :  { %261 = vmatpush.xpose.msk.msra.mxu0 %vm90_vm0, %v74_v26 }
  0x1f   :  { %278 = vmatpush.xpose.msk.msra.mxu1 %vm90_vm0, %v58_v27 }
  0x22   :  { %262 = vmatpush.xpose.msk.msra.mxu0 %vm90_vm0, %v73_v28 }
  0x23   :  { %279 = vmatpush.xpose.msk.msra.mxu1 %vm90_vm0, %v57_v29 }
  0x26   :  { %263 = vmatpush.xpose.msk.msra.mxu0 %vm90_vm0, %v72_v30 }
  0x27   :  { %280 = vmatpush.xpose.msk.msra.mxu1 %vm90_vm0, %v56_v31 }
  0x2a   :  { %264 = vmatpush.xpose.msk.msra.mxu0 %vm90_vm0, %v71_v32 }
  0x2b   :  { %281 = vmatpush.xpose.msk.msra.mxu1 %vm90_vm0, %v55_v33 }
  0x2e   :  { %265 = vmatpush.xpose.msk.msra.mxu0 %vm90_vm0, %v70_v34 }
  0x2f   :  { %282 = vmatpush.xpose.msk.msra.mxu1 %vm90_vm0, %v54_v35 }
  0x32   :  { %266 = vmatpush.xpose.msk.msra.mxu0 %vm90_vm0, %v69_v36 }
  0x33   :  { %283 = vmatpush.xpose.msk.msra.mxu1 %vm90_vm0, %v53_v37 }
  0x36   :  { %267 = vmatpush.xpose.msk.msra.mxu0 %vm90_vm0, %v68_v38 }
  0x37   :  { %284 = vmatpush.xpose.msk.msra.mxu1 %vm90_vm0, %v52_v39 }
  0x3a   :  { %268 = vmatpush.xpose.msk.msra.mxu0 %vm90_vm0, %v67_v40 }
  0x3b   :  { %285 = vmatpush.xpose.msk.msra.mxu1 %vm90_vm0, %v51_v41 }
  0x3e   :  { %269 = vmatpush.xpose.msk.msra.mxu0 %vm90_vm0, %v66_v42 }
  0x3f   :  { %286 = vmatpush.xpose.msk.msra.mxu1 %vm90_vm0, %v50_v43 }
  0x42   :  { %287 = vmatmul.msk.f32.vlgmr.msra.gmra.mxu1 %vm90_vm0, %v49_v44 }
  0x80   :  { %v41_v45 = vpop.xlane.xlu0 %40 }
  0x81   :  { %v47_v48 = vmul.f32 0.00390625, %v41_v45 }
  0x83   :  { %v86_v51 = vperm.slane %v47_v48, %v85_v47 }
  0x88   :  { %v46_v49 = vpop.xlane.xlu0 %45 }
  0x89   :  { %v48_v50 = vmul.f32 0.00390625, %v46_v49 }
  0x8b   :  { %v87_v52 = vperm.slane %v48_v50, %v85_v47 }
  0x8d   :  { %v89_v53 = vsel %vm88_vm2, %v87_v52, %v86_v51 }
  0x8e   :  { %270 = vmatmul.msk.f32.vlgmr.msra.gmra.mxu0 %vm90_vm0, %v89_v53 }
  0xbf   :  { %v229_v54 = vpop.f32.mrf.mxu1 }
 0x10b   :  { %v158_v56 = vpop.f32.mrf.mxu0 }
 0x10c   :  { %v230_v57 = vadd.f32 %v229_v54, %v158_v56 }
 0x10e   :  { %v236_v58 = vadd.f32 %v289_v55, %v230_v57 }
 0x110   :  { %237 = vst [vmem:[#allocation2] sm:$0x3] %v236_v58 }
 0x111   :  { %248 = dma.vmem_to_hbm [thread:$0]  %s244_s10, 32, %s246_s13, [#allocation3]  }
 0x112   :  { %314 = dma.done.wait [#allocation3], 32  }
 0x113   :  { %315 = vsyncadd [#allocation3], 4294967264 }
 0x114   :  { %253 = vsyncpa [#allocation3], 1 }

</bundles_post_ra>
